<compile_context>
chip_gen: v7x
topology: tpu7x:2x2x1
jax: 0.10.0
libtpu: 0.0.40
codegen_flags: <defaults>
</compile_context>

<pallas_src>
import functools

import jax
import jax.numpy as jnp
from jax import lax
from jax.experimental import pallas as pl
from jax.experimental.pallas import tpu as pltpu


def _basic_conv_kernel(x_ref, w_ref, b_ref, o_ref, *, KH, stride, padding, Ho, relu):
    """Conv as KH accumulated matmuls vs. a block-Toeplitz weight + bias + ReLU.

    x_ref : (B, H, W*Cin)     lane-packed input block
    w_ref : (KH, W*Cin, Lp)   Toeplitz weight (W taps / stride / W-pad / BN folded)
    b_ref : (1, Lp)           packed folded bias, lane index = wo*Cout + co
    o_ref : (B, Ho, Lp)       lane-packed output block, Lp = roundup(Wo*Cout, 128)
    """
    B, H, WCin = x_ref.shape
    Lp = o_ref.shape[-1]

    x = x_ref[...]
    if padding > 0:
        # H-direction zero padding only: two tiny zero strips (the W-direction
        # padding is folded into the Toeplitz weight, so no left/right halo and
        # no halo scratch / ring zero-fill at all).
        z = jnp.zeros((B, padding, WCin), x.dtype)
        x = jnp.concatenate([z, x, z], axis=1)               # (B, H + 2*pad, W*Cin)

    acc = None
    for kh in range(KH):                                      # static unroll
        xk = lax.slice(x, (0, kh, 0),
                       (B, kh + stride * (Ho - 1) + 1, WCin),
                       (1, stride, 1))                        # (B, Ho, W*Cin)
        part = jnp.dot(xk.reshape(B * Ho, WCin), w_ref[kh],
                       preferred_element_type=jnp.float32)    # (B*Ho, Lp)
        acc = part if acc is None else acc + part

    acc = acc + b_ref[...]                                    # (1, Lp) broadcasts
    if relu:
        acc = jnp.maximum(acc, 0.0)
    # Split leading dim only (lane dim unchanged) -> cheap, lane-dense store.
    o_ref[...] = acc.reshape(B, Ho, Lp).astype(o_ref.dtype)


def _toeplitz_weight(w_f, W, Wo, stride, padding):
    """Fold the W-direction taps / stride / zero padding into a dense matrix.

    w_f: (KH, KW, Cin, Cout) with BN scale already folded in.
    Returns T: (KH, W*Cin, Wo*Cout) with
      T[kh, w_in*Cin + c, wo*Cout + co] = w_f[kh, w_in - (wo*stride - padding), c, co]
    and zero wherever the tap index falls outside [0, KW), i.e. in the padding.
    """
    KH, KW, Cin, Cout = w_f.shape
    w_in = jnp.arange(W)
    wo = jnp.arange(Wo)
    kw_idx = w_in[:, None] - (wo[None, :] * stride - padding)          # (W, Wo)
    valid = (kw_idx >= 0) & (kw_idx < KW)
    kw_cl = jnp.clip(kw_idx, 0, KW - 1)
    T = w_f[:, kw_cl, :, :]                                            # (KH, W, Wo, Cin, Cout)
    T = T * valid[None, :, :, None, None].astype(w_f.dtype)
    T = jnp.transpose(T, (0, 1, 3, 2, 4))                              # (KH, W, Cin, Wo, Cout)
    return T.reshape(KH, W * Cin, Wo * Cout)


def _interp_matrix(in_size, out_size, dtype=jnp.float32):
    """align_corners=True bilinear interpolation matrix, shape (out_size, in_size)."""
    if out_size == 1:
        pos = jnp.zeros((1,), jnp.float32)
    else:
        pos = jnp.arange(out_size, dtype=jnp.float32) * ((in_size - 1) / (out_size - 1))
    i0 = jnp.clip(jnp.floor(pos).astype(jnp.int32), 0, max(in_size - 2, 0))
    i1 = jnp.minimum(i0 + 1, in_size - 1)
    w = pos - i0.astype(jnp.float32)
    return (jax.nn.one_hot(i0, in_size, dtype=dtype) * (1.0 - w)[:, None]
            + jax.nn.one_hot(i1, in_size, dtype=dtype) * w[:, None])


def _bilinear_upsample_align_corners(x_nhwc, up):
    """F.interpolate(..., size=(up, up), mode='bilinear', align_corners=True)."""
    N, H, W, C = x_nhwc.shape
    wy = _interp_matrix(H, up)   # (up, H)
    wx = _interp_matrix(W, up)   # (up, W)
    return jnp.einsum("yh,nhwc,xw->nyxc", wy, x_nhwc, wx)


def basic_conv(x_nchw, weight, bias, *, stride=1, padding=0, relu=True,
               bn_params=None, up_size=0, batch_tile=None):
    """Forward of BasicConv.

    x_nchw : (N, Cin, H, W)        float32, PyTorch layout
    weight : (Cout, Cin, KH, KW)   PyTorch conv weight layout
    bias   : (Cout,) or None
    bn_params : None, or (gamma, beta, running_mean, running_var) (eval-mode BN)
    """
    N, Cin, H, W = x_nchw.shape
    Cout, Cin_w, KH, KW = weight.shape
    assert Cin_w == Cin  # TODO(synk): groups != 1 / dilation != 1 not supported

    Ho = (H + 2 * padding - KH) // stride + 1
    Wo = (W + 2 * padding - KW) // stride + 1

    # ---- fold eval-mode BN + conv bias into the weight / one bias row -------
    if bn_params is not None:
        gamma, beta, mean, var = bn_params
        scale = gamma / jnp.sqrt(var + 1e-5)
        shift = beta - mean * scale
    else:
        scale = jnp.ones((Cout,), jnp.float32)
        shift = jnp.zeros((Cout,), jnp.float32)
    if bias is None:
        bias = jnp.zeros((Cout,), jnp.float32)
    w_f = jnp.transpose(weight, (2, 3, 1, 0)).astype(jnp.float32) * scale  # (KH,KW,Cin,Cout)
    b_f = bias.astype(jnp.float32) * scale + shift                          # (Cout,)

    # ---- block-Toeplitz weight over the packed (w, c) lane dim --------------
    # TODO(synk): for large W*Cin*Wo*Cout this matrix gets big; fall back to a
    # tap-stacked im2col weight (K-grid-axis accumulation) in that regime.
    L = Wo * Cout
    Lp = ((L + 127) // 128) * 128
    T = _toeplitz_weight(w_f, W, Wo, stride, padding)                 # (KH, W*Cin, L)
    if Lp != L:
        T = jnp.pad(T, ((0, 0), (0, 0), (0, Lp - L)))
    b_packed = jnp.pad(jnp.tile(b_f, Wo), (0, Lp - L)).reshape(1, Lp)

    # ---- lane-pack the activation: NCHW -> NHWC -> (N, H, W*Cin) ------------
    WCin = W * Cin
    x_p = jnp.transpose(x_nchw, (0, 2, 3, 1)).reshape(N, H, WCin).astype(jnp.float32)
    # TODO(synk): bf16 activations/weights end-to-end (f32 accumulation) for
    # real deployments; everything here is f32.

    # ---- batch tile: VMEM-budget driven; >=2 grid steps for v7x megacore ----
    def vmem_bytes(b):
        return (2 * b * H * WCin * 4            # double-buffered input blocks
                + 2 * b * Ho * Lp * 4           # double-buffered output blocks
                + KH * WCin * Lp * 4 + Lp * 4)  # resident Toeplitz weight + bias
    cap = max(1, N // 2) if batch_tile is None else max(1, min(batch_tile, N))
    B = 1
    for b in range(1, N + 1):
        if N % b == 0 and b <= cap and vmem_bytes(b) <= 12 * 1024 * 1024:
            B = b
    grid = (N // B,)

    kernel = functools.partial(_basic_conv_kernel, KH=KH, stride=stride,
                               padding=padding, Ho=Ho, relu=relu)

    flops = 2 * N * Ho * Wo * KH * KW * Cin * Cout
    bytes_accessed = 4 * (N * H * WCin + KH * WCin * Lp + Lp + N * Ho * Lp)

    out = pl.pallas_call(
        kernel,
        out_shape=jax.ShapeDtypeStruct((N, Ho, Lp), jnp.float32),
        grid_spec=pltpu.PrefetchScalarGridSpec(
            num_scalar_prefetch=0,
            grid=grid,
            in_specs=[
                pl.BlockSpec((B, H, WCin), lambda g: (g, 0, 0)),
                pl.BlockSpec((KH, WCin, Lp), lambda g: (0, 0, 0)),   # resident
                pl.BlockSpec((1, Lp), lambda g: (0, 0)),             # resident
            ],
            out_specs=pl.BlockSpec((B, Ho, Lp), lambda g: (g, 0, 0)),
        ),
        compiler_params=pltpu.CompilerParams(
            dimension_semantics=("parallel",),
            vmem_limit_bytes=32 * 1024 * 1024),
        cost_estimate=pl.CostEstimate(flops=flops, transcendentals=0,
                                      bytes_accessed=bytes_accessed),
    )(x_p, T, b_packed)

    # unpack lanes (wo, co) -> (Wo, Cout); drop the <=127 padding lanes
    out = out[..., :L].reshape(N, Ho, Wo, Cout)
    # TODO(synk): fuse the bilinear upsample (two small interp matmuls) and the
    # NHWC->NCHW transpose into the kernel epilogue while the block is
    # VMEM-resident.
    if up_size > 0:
        out = _bilinear_upsample_align_corners(out, up_size)
    return jnp.transpose(out, (0, 3, 1, 2))                  # NHWC -> NCHW


def _reference(x_nchw, weight, bias, *, stride, padding, relu, bn_params, up_size):
    """Plain-JAX reference (lax conv) for correctness checking."""
    out = lax.conv_general_dilated(
        x_nchw, weight, window_strides=(stride, stride),
        padding=[(padding, padding), (padding, padding)],
        dimension_numbers=("NCHW", "OIHW", "NCHW"))
    out = out + bias[None, :, None, None]
    if bn_params is not None:
        gamma, beta, mean, var = bn_params
        out = (out - mean[None, :, None, None]) / jnp.sqrt(var[None, :, None, None] + 1e-5)
        out = out * gamma[None, :, None, None] + beta[None, :, None, None]
    if relu:
        out = jnp.maximum(out, 0.0)
    if up_size > 0:
        out_nhwc = jnp.transpose(out, (0, 2, 3, 1))
        out = jnp.transpose(_bilinear_upsample_align_corners(out_nhwc, up_size),
                            (0, 3, 1, 2))
    return out


if __name__ == "__main__":
    key = jax.random.PRNGKey(0)
    k_x, k_w, k_b, k_g, k_be = jax.random.split(key, 5)

    # BasicConv(in_planes=8, out_planes=16, kernel_size=3, stride=1, padding=1,
    #           relu=True, bn=False, bias=True, up_size=0)
    N, Cin, H, W = 2, 8, 16, 16
    Cout, KH, KW = 16, 3, 3

    x = jax.random.normal(k_x, (N, Cin, H, W), jnp.float32)
    weight = 0.1 * jax.random.normal(k_w, (Cout, Cin, KH, KW), jnp.float32)
    bias = 0.1 * jax.random.normal(k_b, (Cout,), jnp.float32)

    out = basic_conv(x, weight, bias, stride=1, padding=1, relu=True,
                     bn_params=None, up_size=0)
    jax.block_until_ready(out)
    ref = _reference(x, weight, bias, stride=1, padding=1, relu=True,
                     bn_params=None, up_size=0)
    assert out.shape == (N, Cout, H, W)
    assert jnp.max(jnp.abs(out - ref)) < 3e-4

    # bn=True (eval-mode stats) + up_size>0 path.
    gamma = 1.0 + 0.05 * jax.random.normal(k_g, (Cout,), jnp.float32)
    beta = 0.05 * jax.random.normal(k_be, (Cout,), jnp.float32)
    r_mean = jnp.zeros((Cout,), jnp.float32)
    r_var = jnp.ones((Cout,), jnp.float32)
    out2 = basic_conv(x, weight, bias, stride=1, padding=1, relu=True,
                      bn_params=(gamma, beta, r_mean, r_var), up_size=32)
    jax.block_until_ready(out2)
    ref2 = _reference(x, weight, bias, stride=1, padding=1, relu=True,
                      bn_params=(gamma, beta, r_mean, r_var), up_size=32)
    assert out2.shape == (N, Cout, 32, 32)
    assert jnp.max(jnp.abs(out2 - ref2)) < 3e-4

    # padding == 0 / stride == 2 / no-relu path.
    out3 = basic_conv(x, weight, bias, stride=2, padding=0, relu=False,
                      bn_params=None, up_size=0)
    jax.block_until_ready(out3)
    ref3 = _reference(x, weight, bias, stride=2, padding=0, relu=False,
                      bn_params=None, up_size=0)
    assert out3.shape == ref3.shape
    assert jnp.max(jnp.abs(out3 - ref3)) < 3e-4

    print("KERNEL_OK")
</pallas_src>

<mosaic_0001>
module attributes {stable_mosaic.version = 11 : i64} {
  func.func @_basic_conv_kernel(%arg0: i32, %arg1: memref<1x16x128xf32, #tpu.memory_space<vmem>>, %arg2: memref<3x128x256xf32, #tpu.memory_space<vmem>>, %arg3: memref<1x256xf32, #tpu.memory_space<vmem>>, %arg4: memref<1x16x256xf32, #tpu.memory_space<vmem>>) attributes {dimension_semantics = [#tpu.dimension_semantics<parallel>], iteration_bounds = array<i64: 2>, scalar_prefetch = 0 : i64, scratch_operands = 0 : i64, tpu.core_type = #tpu.core_type<tc>, window_params = [{transform_indices = @transform_0, window_bounds = array<i64: 1, 16, 128>}, {pipeline_mode = #tpu.pipeline_mode<synchronous>, transform_indices = @transform_1, window_bounds = array<i64: 3, 128, 256>}, {pipeline_mode = #tpu.pipeline_mode<synchronous>, transform_indices = @transform_2, window_bounds = array<i64: 1, 256>}, {transform_indices = @transform_3, window_bounds = array<i64: 1, 16, 256>}]} {
    %c0 = arith.constant 0 : index
    %c0_0 = arith.constant 0 : index
    %c0_1 = arith.constant 0 : index
    %0 = vector.load %arg1[%c0, %c0_0, %c0_1] : memref<1x16x128xf32, #tpu.memory_space<vmem>>, vector<1x16x128xf32>
    %cst = arith.constant 0.000000e+00 : f32
    %1 = vector.broadcast %cst : f32 to vector<1x1x128xf32>
    %2 = tpu.concatenate %1, %0, %1 in 1 : vector<1x1x128xf32>, vector<1x16x128xf32>, vector<1x1x128xf32> -> vector<1x18x128xf32>
    %3 = vector.extract_strided_slice %2 {offsets = [0, 0, 0], sizes = [1, 16, 128], strides = [1, 1, 1]} : vector<1x18x128xf32> to vector<1x16x128xf32>
    %4 = vector.shape_cast %3 : vector<1x16x128xf32> to vector<16x128xf32>
    %c0_2 = arith.constant 0 : index
    %c0_3 = arith.constant 0 : index
    %c0_4 = arith.constant 0 : index
    %5 = vector.load %arg2[%c0_2, %c0_3, %c0_4] : memref<3x128x256xf32, #tpu.memory_space<vmem>>, vector<1x128x256xf32>
    %6 = vector.shape_cast %5 : vector<1x128x256xf32> to vector<128x256xf32>
    %cst_5 = arith.constant dense<0.000000e+00> : vector<16x256xf32>
    %7 = tpu.matmul %4, %6, %cst_5 {dimension_numbers = #tpu.dot_dimension_numbers<[1], [0], [0], [1], [0, 0, 1, 1], [], []>} : vector<16x128xf32>, vector<128x256xf32>, vector<16x256xf32> -> vector<16x256xf32>
    %8 = vector.extract_strided_slice %2 {offsets = [0, 1, 0], sizes = [1, 16, 128], strides = [1, 1, 1]} : vector<1x18x128xf32> to vector<1x16x128xf32>
    %9 = vector.shape_cast %8 : vector<1x16x128xf32> to vector<16x128xf32>
    %c1 = arith.constant 1 : index
    %c0_6 = arith.constant 0 : index
    %c0_7 = arith.constant 0 : index
    %10 = vector.load %arg2[%c1, %c0_6, %c0_7] : memref<3x128x256xf32, #tpu.memory_space<vmem>>, vector<1x128x256xf32>
    %11 = vector.shape_cast %10 : vector<1x128x256xf32> to vector<128x256xf32>
    %cst_8 = arith.constant dense<0.000000e+00> : vector<16x256xf32>
    %12 = tpu.matmul %9, %11, %cst_8 {dimension_numbers = #tpu.dot_dimension_numbers<[1], [0], [0], [1], [0, 0, 1, 1], [], []>} : vector<16x128xf32>, vector<128x256xf32>, vector<16x256xf32> -> vector<16x256xf32>
    %13 = arith.addf %7, %12 : vector<16x256xf32>
    %14 = vector.extract_strided_slice %2 {offsets = [0, 2, 0], sizes = [1, 16, 128], strides = [1, 1, 1]} : vector<1x18x128xf32> to vector<1x16x128xf32>
    %15 = vector.shape_cast %14 : vector<1x16x128xf32> to vector<16x128xf32>
    %c2 = arith.constant 2 : index
    %c0_9 = arith.constant 0 : index
    %c0_10 = arith.constant 0 : index
    %16 = vector.load %arg2[%c2, %c0_9, %c0_10] : memref<3x128x256xf32, #tpu.memory_space<vmem>>, vector<1x128x256xf32>
    %17 = vector.shape_cast %16 : vector<1x128x256xf32> to vector<128x256xf32>
    %cst_11 = arith.constant dense<0.000000e+00> : vector<16x256xf32>
    %18 = tpu.matmul %15, %17, %cst_11 {dimension_numbers = #tpu.dot_dimension_numbers<[1], [0], [0], [1], [0, 0, 1, 1], [], []>} : vector<16x128xf32>, vector<128x256xf32>, vector<16x256xf32> -> vector<16x256xf32>
    %19 = arith.addf %13, %18 : vector<16x256xf32>
    %c0_12 = arith.constant 0 : index
    %c0_13 = arith.constant 0 : index
    %20 = vector.load %arg3[%c0_12, %c0_13] : memref<1x256xf32, #tpu.memory_space<vmem>>, vector<1x256xf32>
    %21 = vector.broadcast %20 : vector<1x256xf32> to vector<16x256xf32>
    %22 = arith.addf %19, %21 : vector<16x256xf32>
    %cst_14 = arith.constant 0.000000e+00 : f32
    %23 = vector.broadcast %cst_14 : f32 to vector<16x256xf32>
    %24 = arith.maximumf %22, %23 : vector<16x256xf32>
    %25 = vector.shape_cast %24 : vector<16x256xf32> to vector<1x16x256xf32>
    %c0_15 = arith.constant 0 : index
    %c0_16 = arith.constant 0 : index
    %c0_17 = arith.constant 0 : index
    %26 = vector.load %arg4[%c0_15, %c0_16, %c0_17] : memref<1x16x256xf32, #tpu.memory_space<vmem>>, vector<1x16x256xf32>
    tpu.vector_store %arg4[%c0_15, %c0_16, %c0_17], %25 {strides = array<i32>} : memref<1x16x256xf32, #tpu.memory_space<vmem>>, vector<1x16x256xf32>,
    return
  }
  func.func @transform_0(%arg0: i32) -> (i32, i32, i32) {
    %c0_i32 = arith.constant 0 : i32
    %c0_i32_0 = arith.constant 0 : i32
    %c0_i32_1 = arith.constant 0 : i32
    return %arg0, %c0_i32, %c0_i32_0 : i32, i32, i32
  }
  func.func @transform_1(%arg0: i32) -> (i32, i32, i32) {
    %c0_i32 = arith.constant 0 : i32
    %c0_i32_0 = arith.constant 0 : i32
    %c0_i32_1 = arith.constant 0 : i32
    %c0_i32_2 = arith.constant 0 : i32
    return %c0_i32, %c0_i32_0, %c0_i32_1 : i32, i32, i32
  }
  func.func @transform_2(%arg0: i32) -> (i32, i32) {
    %c0_i32 = arith.constant 0 : i32
    %c0_i32_0 = arith.constant 0 : i32
    %c0_i32_1 = arith.constant 0 : i32
    return %c0_i32, %c0_i32_0 : i32, i32
  }
  func.func @transform_3(%arg0: i32) -> (i32, i32, i32) {
    %c0_i32 = arith.constant 0 : i32
    %c0_i32_0 = arith.constant 0 : i32
    %c0_i32_1 = arith.constant 0 : i32
    return %arg0, %c0_i32, %c0_i32_0 : i32, i32, i32
  }
}

</mosaic_0001>

<bundles_post_ra>
// kernel: tpu_custom_call.1
= control target key start
LH: loop header
LB: loop body
LE: loop exit
PB: predicated region body
PF: predicated region fallthrough
CT: control target
= control target key end

     0   :  { %8 = vsyncpa [#allocation3], 0  ;;  %s1287_s0 = inlined_call_operand.hbm [shape: f32[2,16,128], index: 0, kind: input, shape index: {}]   ;;  %s1288_s1 = inlined_call_operand.hbm [shape: f32[3,128,256], index: 1, kind: input, shape index: {}]   ;;  %s1289_s2 = inlined_call_operand.vmem [shape: f32[1,256], index: 2, kind: input, shape index: {}]   ;;  %s1290_s3 = inlined_call_operand.hbm [shape: f32[2,16,256], index: 3, kind: output, shape index: {}]  }
   0x1   :  { %10 = vsyncpa [#allocation3 + $0x1], 0 }
   0x2   :  { %11 = vsyncpa [#allocation6], 0 }
   0x3   :  { %12 = vsyncpa [#allocation4], 0 }
   0x4   :  { %14 = vsyncpa [#allocation4 + $0x1], 0  ;;  %s1053_s12 = smov 0   ;;  %s1055_s13 = smov 0  }
   0x5   :  { %s1057_s14 = smov 0   ;;  %s1059_s15 = smov 0  }
   0x6 LB: > { %s1074_s16 = sadd.s32 4294967295, %s1021_s15   ;;  %s689_s17 = sadd.s32 4294967294, %s1021_s15   ;;  %s1021_s15 = sphi %s1059_s15, %s1310_s15   ;;  %s1017_s14 = sphi %s1057_s14, %s1309_s14   ;;  %s1013_s13 = sphi %s1055_s13, %s1308_s13   ;;  %s1009_s12 = sphi %s1053_s12, %s1307_s12  }
   0x7   : > { %p40_p0 = scmp.ne.s32.totalorder %s1013_s13, %s1009_s12  ;;  %p1291_p1 = scmp.eq.s32.totalorder %s1074_s16, 0 }
   0x8   : > { %p112_p3 = scmp.eq.s32.totalorder %s689_s17, 1  ;;  %p690_p5 = scmp.ge.s32.totalorder %s1021_s15, 1 }
   0x9   : > { %p1083_p4 = por %p1291_p1, %p40_p0  ;;  %p119_p7 = scmp.lt.s32.totalorder %s1021_s15, 3 }
   0xa   : > { %p1088_p6 = por %p112_p3, %p40_p0  ;;  %s1023_s21 = smov [#allocation5]  }
   0xb   : > { %s1294_s18 = scalar_select %p1083_p4, 1, 0 }
   0xc   : > { %s1295_s19 = scalar_select %p1088_p6, 1, 0 }
   0xd   : > { %p1093_p8 = pnand %p690_p5, %p119_p7  ;;  %s131_s22 = sshll.u32 %s1023_s21, 4  ;;  %s1097_s22 = int_to_ptr.vmem [resolvable:$true] %s131_s22 }
   0xe   : > { %s1109_s24 = sadd.s32 1, %s1021_s15   ;;  %s27_s25 = sadd.s32 1, %s1017_s14 }
   0xf   : > { %s1296_s20 = scalar_select %p1093_p8, 1, 0 }
  0x10   : > { %p837_p9 = pneg %p1093_p8  ;;  %s24_s26 = ssub.s32 %s1021_s15, %s1109_s24 }
  0x11   : > { %s893_s29 = scalar_lea.hbm %s1288_s1, 12288 }
  0x12   : > { %p1104_p11 = pnand %p837_p9, %p1291_p1  ;;  %p894_p12 = scmp.ne.s32.totalorder %s1288_s1, %s893_s29 }
  0x13   : > { %p900_p5 = scmp.lt.u32.totalorder %s893_s29, %s1288_s1 }
  0x14   : > { %p895_p13 = pneg %p1104_p11 }
  0x16   : > { %p896_p0 = pnand %p895_p13, %p894_p12 }
  0x18   : > { %p897_p3 = pneg %p896_p0 }
  0x1a   : > { %p902_p7 = pnand %p900_p5, %p897_p3 }
  0x1c   : > { %905 = shalt.err (!%p902_p7)
}
  0x1d   : > { %s906_s7 = scalar_lea.vmem %s1097_s22, 12288  ;;  %p914_p2 = scmp.lt.s32.totalorder %s1097_s22, %s1097_s22 }
  0x1e   : > { %p907_p9 = scmp.ne.s32.totalorder %s1097_s22, %s906_s7  ;;  %p915_p6 = scmp.lt.s32.totalorder %s906_s7, %s906_s7 }
  0x20   : > { %p909_p10 = pnand %p907_p9, %p895_p13  ;;  %p916_p4 = por %p915_p6, %p914_p2 }
  0x22   : > { %p910_p1 = pneg %p909_p10 }
  0x24   : > { %p917_p8 = pnand %p916_p4, %p910_p1 }
  0x26   : > { %920 = shalt.err (!%p917_p8)
}
  0x27   : > { %s1024_s8 = smov 256   ;;  %s1025_s9 = smov 16  }
  0x28   : > { %840 = dma.hbm_to_vmem [thread:$0]  (!%p1104_p11), %s1288_s1, 12288, %s1097_s22, [#allocation6], %s1024_s8, %s1024_s8, %s1025_s9  }
  0x29   : > { %p25_p2 = scmp.eq.s32.totalorder %s24_s26, 0  ;;  %p34_p1 = scmp.ne.s32.totalorder %s1017_s14, %s1013_s13 }
  0x2a   : > { %p35_p4 = scmp.eq.s32.totalorder %s1021_s15, 0  ;;  %p850_p6 = scmp.lt.s32.totalorder %s1021_s15, 2 }
  0x2b   : > { %s1140_s17 = scalar_select %p25_p2, %s1017_s14, %s27_s25  }
  0x2c   : > { %p36_p8 = por %p35_p4, %p34_p1  ;;  %p1298_p10 = scmp.eq.s32.totalorder %s1074_s16, 1 }
  0x2d   : > { %s148_s27 = sand.u32 1, %s1017_s14   ;;  %s707_s28 = sshll.u32 %s1021_s15, 8 }
  0x2e   : > { %p1144_p12 = por %p1298_p10, %p34_p1  ;;  %s693_s29 = sshll.u32 %s148_s27, 4 }
  0x2f   : > { %s1153_s4 = scalar_lea.hbm %s1287_s0, %s707_s28  ;;  %s152_s22 = scalar_lea.vmem [#allocation2], %s693_s29 }
  0x30   : > { %s159_s25 = sshll.u32 %s152_s22, 4  ;;  %p1155_p11 = pnand %p850_p6, %p36_p8  ;;  %s1159_s25 = int_to_ptr.vmem [resolvable:$true] %s159_s25 }
  0x31   : > { %s1161_s5 = scalar_lea.sflag [#allocation3], %s148_s27  ;;  %s921_s6 = scalar_lea.hbm %s1153_s4, 256 }
  0x32   : > { %p922_p13 = scmp.ne.s32.totalorder %s1153_s4, %s921_s6  ;;  %p923_p0 = pneg %p1155_p11 }
  0x33   : > { %s926_s9 = scalar_lea.hbm %s1287_s0, 512  ;;  %p927_p7 = scmp.lt.u32.totalorder %s1153_s4, %s1287_s0 }
  0x34   : > { %p924_p3 = pnand %p923_p0, %p922_p13  ;;  %p928_p9 = scmp.lt.u32.totalorder %s926_s9, %s921_s6 }
  0x35   : > { %p930_p1 = scmp.lt.u32.totalorder %s921_s6, %s1153_s4 }
  0x36   : > { %p925_p5 = pneg %p924_p3  ;;  %p929_p2 = por %p928_p9, %p927_p7 }
  0x38   : > { %p931_p4 = por %p930_p1, %p929_p2 }
  0x3a   : > { %p932_p6 = pnand %p931_p4, %p925_p5 }
  0x3c   : > { %935 = shalt.err (!%p932_p6)
}
  0x3d   : > { %s936_s27 = scalar_lea.vmem %s1159_s25, 256  ;;  %s1026_s28 = smov [#allocation2]  }
  0x3e   : > { %p937_p8 = scmp.ne.s32.totalorder %s1159_s25, %s936_s27  ;;  %s941_s29 = sshll.u32 %s1026_s28, 4  ;;  %s942_s29 = int_to_ptr.vmem [resolvable:$false] %s941_s29 }
  0x3f   : > { %s943_s23 = scalar_lea.vmem %s942_s29, 512  ;;  %p944_p3 = scmp.lt.s32.totalorder %s1159_s25, %s942_s29 }
  0x40   : > { %p939_p10 = pnand %p937_p8, %p923_p0  ;;  %p945_p7 = scmp.lt.s32.totalorder %s943_s23, %s936_s27 }
  0x42   : > { %p940_p13 = pneg %p939_p10  ;;  %p946_p9 = por %p945_p7, %p944_p3 }
  0x44   : > { %p947_p2 = pnand %p946_p9, %p940_p13 }
  0x46   : > { %950 = shalt.err (!%p947_p2)
}
  0x47   : > { %s1027_s30 = smov 128   ;;  %s1028_s22 = smov 8  }
  0x48   : > { %844 = dma.hbm_to_vmem [thread:$0]  (!%p1155_p11), %s1153_s4, 256, %s1159_s25, %s1161_s5, %s1027_s30, %s1027_s30, %s1028_s22  }
  0x49   : > { %p1301_p0 = scmp.ne.s32.totalorder %s1296_s20, 0 }
  0x4a   : > { %s1192_s6 = sand.u32 (!%p1301_p0), 1, %s1013_s13   ;;  %p1302_p5 = scmp.ne.s32.totalorder (!%p1301_p0), %s1294_s18, 0 }
  0x4b   : > { %171 = sbr.rel (%p1301_p0) target bundleno = 389 (0x185), region = 32  ;;  %s697_s7 = sshll.u32 (!%p1301_p0), %s1192_s6, 4 }
  0x4c   : > { %s174_s8 = scalar_lea.sflag (!%p1301_p0), [#allocation3], %s1192_s6  ;;  %s1196_s9 = scalar_lea.vmem (!%p1301_p0), [#allocation2], %s697_s7 }
  0x52   : > { %996 = dma.done.wait (%p1302_p5), %s174_s8, 256  }
  0x53   : > { %998 = vsyncadd (%p1302_p5), %s174_s8, 4294967040  ;;  %p1303_p11 = scmp.eq.s32.totalorder %s1074_s16, 0 }
  0x55   : > { %1000 = dma.done.wait (%p1303_p11), [#allocation6], 12288   ;;  %p1304_p1 = pmov %p1303_p11 }
  0x56   : > { %v1029_v0 = vmov 0.0   ;;  %v251_v1 = vld [vmem:[#allocation5 + $0x108] sm:$0xff]  ;;  %v253_v2 = vld [vmem:[#allocation5 + $0x118] sm:$0xff]  ;;  %v250_v6 = vld [vmem:[#allocation5 + $0x100] sm:$0xff]  ;;  %vm208_vm0 = vcmask 1040384   ;;  %vm284_vm1 = vcmask 1046528  }
  0x57   : > { %1002 = vsyncadd (%p1304_p1), [#allocation6], 4294955008  ;;  %356 = vmatprep.mubr.f32.mxu1 %v1029_v0  ;;  %433 = vmatprep.mubr.f32.mxu0 %v1029_v0  ;;  %v218_v3 = vld [vmem:[#allocation5 + $0x8] sm:$0xff]  ;;  %v709_v4 = vpack.c.bf16 %v253_v2, %v251_v1  ;;  %v220_v5 = vld [vmem:[#allocation5 + $0x18] sm:$0xff]  ;;  %vm479_vm3 = vcmask 1045504   ;;  %s699_s18 = sshll.u32 %s1192_s6, 5 }
  0x58   : > { %v252_v7 = vld [vmem:[#allocation5 + $0x110] sm:$0xff]  ;;  %v741_v8 = vpack.c.bf16 %v220_v5, %v218_v3  ;;  %v217_v10 = vld [vmem:[#allocation5] sm:$0xff]  ;;  %v255_v12 = vld [vmem:[#allocation5 + $0x128] sm:$0xff]  ;;  %s203_s25 = scalar_lea.vmem [#allocation7], %s699_s18  ;;  %s708_s5 = sshll.u32 %s1074_s16, 9 }
  0x59   : > { %v711_v9 = vpack.c.bf16 %v252_v7, %v250_v6  ;;  %v219_v11 = vld [vmem:[#allocation5 + $0x10] sm:$0xff]  ;;  %710 = vmatprep.subr.bf16.mxu1 %v709_v4  ;;  %v257_v14 = vld [vmem:[#allocation5 + $0x138] sm:$0xff]  ;;  %v222_v15 = vld [vmem:[#allocation5 + $0x28] sm:$0xff]  ;;  %s606_s26 = sshll.u32 %s203_s25, 4  ;;  %s1243_s27 = scalar_lea.hbm %s1290_s3, %s708_s5  ;;  %s1238_s26 = int_to_ptr.vmem [resolvable:$true] %s606_s26 }
  0x5a   : > { %v743_v13 = vpack.c.bf16 %v219_v11, %v217_v10  ;;  %v224_v16 = vld [vmem:[#allocation5 + $0x38] sm:$0xff]  ;;  %742 = vmatprep.subr.bf16.mxu0 %v741_v8  ;;  %v713_v17 = vpack.c.bf16 %v257_v14, %v255_v12  ;;  %v254_v19 = vld [vmem:[#allocation5 + $0x120] sm:$0xff]  ;;  %v256_v20 = vld [vmem:[#allocation5 + $0x130] sm:$0xff]  ;;  %s593_s16 = scalar_lea.sflag [#allocation4], %s1192_s6  ;;  %s951_s28 = scalar_lea.vmem %s1238_s26, 512 }
  0x5b   : > { %712 = vmatpush1.bf16.msra.mxu1 %v711_v9  ;;  %v745_v18 = vpack.c.bf16 %v224_v16, %v222_v15  ;;  %v221_v21 = vld [vmem:[#allocation5 + $0x20] sm:$0xff]  ;;  %v715_v22 = vpack.c.bf16 %v256_v20, %v254_v19  ;;  %v223_v23 = vld [vmem:[#allocation5 + $0x30] sm:$0xff]  ;;  %v259_v24 = vld [vmem:[#allocation5 + $0x148] sm:$0xff]  ;;  %p952_p4 = scmp.ne.s32.totalorder %s1238_s26, %s951_s28  ;;  %s1030_s29 = smov [#allocation7]  }
  0x5c   : > { %744 = vmatpush1.bf16.msra.mxu0 %v743_v13  ;;  %v261_v25 = vld [vmem:[#allocation5 + $0x158] sm:$0xff]  ;;  %714 = vmatprep.subr.bf16.mxu1 %v713_v17  ;;  %v747_v26 = vpack.c.bf16 %v223_v23, %v221_v21  ;;  %v226_v28 = vld [vmem:[#allocation5 + $0x48] sm:$0xff]  ;;  %v258_v30 = vld [vmem:[#allocation5 + $0x140] sm:$0xff]  ;;  %s955_s23 = sshll.u32 %s1030_s29, 4  ;;  %s956_s23 = int_to_ptr.vmem [resolvable:$false] %s955_s23 }
  0x5d   : > { %746 = vmatprep.subr.bf16.mxu0 %v745_v18  ;;  %v717_v27 = vpack.c.bf16 %v261_v25, %v259_v24  ;;  %v228_v29 = vld [vmem:[#allocation5 + $0x58] sm:$0xff]  ;;  %v260_v32 = vld [vmem:[#allocation5 + $0x150] sm:$0xff]  ;;  %v225_v33 = vld [vmem:[#allocation5 + $0x40] sm:$0xff]  ;;  %p953_p6 = pnand %p952_p4, %p1144_p12  ;;  %s957_s30 = scalar_lea.vmem %s956_s23, 1024 }
  0x5e   : > { %v749_v31 = vpack.c.bf16 %v228_v29, %v226_v28  ;;  %v227_v34 = vld [vmem:[#allocation5 + $0x50] sm:$0xff]  ;;  %v719_v35 = vpack.c.bf16 %v260_v32, %v258_v30  ;;  %v263_v36 = vld [vmem:[#allocation5 + $0x168] sm:$0xff]  ;;  %v265_v37 = vld [vmem:[#allocation5 + $0x178] sm:$0xff]  ;;  %p958_p10 = scmp.lt.s32.totalorder %s1238_s26, %s956_s23  ;;  %p959_p13 = scmp.lt.s32.totalorder %s957_s30, %s951_s28 }
  0x5f   : > { %716 = vmatpush1.bf16.msra.mxu1 %v715_v22  ;;  %v230_v38 = vld [vmem:[#allocation5 + $0x68] sm:$0xff]  ;;  %v751_v39 = vpack.c.bf16 %v227_v34, %v225_v33  ;;  %v721_v40 = vpack.c.bf16 %v265_v37, %v263_v36  ;;  %v232_v41 = vld [vmem:[#allocation5 + $0x78] sm:$0xff]  ;;  %v262_v42 = vld [vmem:[#allocation5 + $0x160] sm:$0xff]  ;;  %p954_p8 = pneg %p953_p6 }
  0x60   : > { %748 = vmatpush1.bf16.msra.mxu0 %v747_v26  ;;  %718 = vmatprep.subr.bf16.mxu1 %v717_v27  ;;  %v264_v43 = vld [vmem:[#allocation5 + $0x170] sm:$0xff]  ;;  %v753_v44 = vpack.c.bf16 %v232_v41, %v230_v38  ;;  %v229_v45 = vld [vmem:[#allocation5 + $0x60] sm:$0xff]  ;;  %v267_v47 = vld [vmem:[#allocation5 + $0x188] sm:$0xff]  ;;  %p960_p3 = por %p959_p13, %p958_p10 }
  0x61   : > { %750 = vmatprep.subr.bf16.mxu0 %v749_v31  ;;  %v231_v46 = vld [vmem:[#allocation5 + $0x70] sm:$0xff]  ;;  %v269_v48 = vld [vmem:[#allocation5 + $0x198] sm:$0xff]  ;;  %v234_v49 = vld [vmem:[#allocation5 + $0x88] sm:$0xff]  ;;  %v723_v51 = vpack.c.bf16 %v264_v43, %v262_v42 }
  0x62   : > { %v236_v50 = vld [vmem:[#allocation5 + $0x98] sm:$0xff]  ;;  %v755_v52 = vpack.c.bf16 %v231_v46, %v229_v45  ;;  %v725_v53 = vpack.c.bf16 %v269_v48, %v267_v47  ;;  %v266_v54 = vld [vmem:[#allocation5 + $0x180] sm:$0xff]  ;;  %v268_v55 = vld [vmem:[#allocation5 + $0x190] sm:$0xff]  ;;  %p961_p7 = pnand %p960_p3, %p954_p8 }
  0x63   : > { %720 = vmatpush1.bf16.msra.mxu1 %v719_v35  ;;  %v233_v56 = vld [vmem:[#allocation5 + $0x80] sm:$0xff]  ;;  %v757_v57 = vpack.c.bf16 %v236_v50, %v234_v49  ;;  %v235_v58 = vld [vmem:[#allocation5 + $0x90] sm:$0xff]  ;;  %v271_v59 = vld [vmem:[#allocation5 + $0x1a8] sm:$0xff]  ;;  %v727_v63 = vpack.c.bf16 %v268_v55, %v266_v54 }
  0x64   : > { %752 = vmatpush1.bf16.msra.mxu0 %v751_v39  ;;  %722 = vmatprep.subr.bf16.mxu1 %v721_v40  ;;  %v273_v60 = vld [vmem:[#allocation5 + $0x1b8] sm:$0xff]  ;;  %v238_v61 = vld [vmem:[#allocation5 + $0xa8] sm:$0xff]  ;;  %v759_v1 = vpack.c.bf16 %v235_v58, %v233_v56  ;;  %v270_v3 = vld [vmem:[#allocation5 + $0x1a0] sm:$0xff] }
  0x65   : > { %754 = vmatprep.subr.bf16.mxu0 %v753_v44  ;;  %v240_v62 = vld [vmem:[#allocation5 + $0xb8] sm:$0xff]  ;;  %v729_v2 = vpack.c.bf16 %v273_v60, %v271_v59  ;;  %v272_v4 = vld [vmem:[#allocation5 + $0x1b0] sm:$0xff]  ;;  %v237_v5 = vld [vmem:[#allocation5 + $0xa0] sm:$0xff] }
  0x66   : > { %v761_v6 = vpack.c.bf16 %v240_v62, %v238_v61  ;;  %v239_v7 = vld [vmem:[#allocation5 + $0xb0] sm:$0xff]  ;;  %v275_v8 = vld [vmem:[#allocation5 + $0x1c8] sm:$0xff]  ;;  %v277_v9 = vld [vmem:[#allocation5 + $0x1d8] sm:$0xff]  ;;  %v731_v12 = vpack.c.bf16 %v272_v4, %v270_v3 }
  0x67   : > { %724 = vmatpush1.bf16.msra.mxu1 %v723_v51  ;;  %v242_v10 = vld [vmem:[#allocation5 + $0xc8] sm:$0xff]  ;;  %v244_v11 = vld [vmem:[#allocation5 + $0xd8] sm:$0xff]  ;;  %v274_v13 = vld [vmem:[#allocation5 + $0x1c0] sm:$0xff]  ;;  %v763_v15 = vpack.c.bf16 %v239_v7, %v237_v5  ;;  %v733_v16 = vpack.c.bf16 %v277_v9, %v275_v8 }
  0x68   : > { %756 = vmatpush1.bf16.msra.mxu0 %v755_v52  ;;  %726 = vmatprep.subr.bf16.mxu1 %v725_v53  ;;  %v276_v14 = vld [vmem:[#allocation5 + $0x1d0] sm:$0xff]  ;;  %v241_v17 = vld [vmem:[#allocation5 + $0xc0] sm:$0xff]  ;;  %v205_v19 = vld [vmem:[%s1196_s9 + $0x8] sm:$0xff]  ;;  %v765_v20 = vpack.c.bf16 %v244_v11, %v242_v10 }
  0x69   : > { %758 = vmatprep.subr.bf16.mxu0 %v757_v57  ;;  %v204_v18 = vld [vmem:[%s1196_s9] sm:$0xff]  ;;  %v279_v22 = vld [vmem:[#allocation5 + $0x1e8] sm:$0xff]  ;;  %v281_v23 = vld [vmem:[#allocation5 + $0x1f8] sm:$0xff]  ;;  %v210_v25 = vrot.slane %v205_v19, 7  ;;  %v735_v28 = vpack.c.bf16 %v276_v14, %v274_v13 }
  0x6a   : > { %v243_v21 = vld [vmem:[#allocation5 + $0xd0] sm:$0xff]  ;;  %v209_v24 = vrot.slane %v204_v18, 7  ;;  %v246_v26 = vld [vmem:[#allocation5 + $0xe8] sm:$0xff]  ;;  %v248_v27 = vld [vmem:[#allocation5 + $0xf8] sm:$0xff]  ;;  %v737_v30 = vpack.c.bf16 %v281_v23, %v279_v22 }
  0x6b   : > { %728 = vmatpush1.bf16.msra.mxu1 %v727_v63  ;;  %v767_v29 = vpack.c.bf16 %v243_v21, %v241_v17  ;;  %v278_v31 = vld [vmem:[#allocation5 + $0x1e0] sm:$0xff]  ;;  %v280_v32 = vld [vmem:[#allocation5 + $0x1f0] sm:$0xff]  ;;  %v769_v36 = vpack.c.bf16 %v248_v27, %v246_v26  ;;  %v448_v38 = vld [vmem:[#allocation5 + $0x208] sm:$0xff]  ;;  %v1219_v47 = vsel %vm208_vm0, %v210_v25, 0.0 }
  0x6c   : > { %760 = vmatpush1.bf16.msra.mxu0 %v759_v1  ;;  %730 = vmatprep.subr.bf16.mxu1 %v729_v2  ;;  %v245_v33 = vld [vmem:[#allocation5 + $0xe0] sm:$0xff]  ;;  %v1211_v34 = vsel %vm208_vm0, %v209_v24, %v210_v25  ;;  %v1214_v35 = vsel %vm208_vm0, 0.0, %v209_v24  ;;  %v247_v37 = vld [vmem:[#allocation5 + $0xf0] sm:$0xff]  ;;  %v450_v39 = vld [vmem:[#allocation5 + $0x218] sm:$0xff]  ;;  %v739_v40 = vpack.c.bf16 %v280_v32, %v278_v31  ;;  %v288_v52 = vrot.slane %v1219_v47, 1 }
  0x6d   : > { %762 = vmatprep.subr.bf16.mxu0 %v761_v6  ;;  %v285_v41 = vrot.slane %v1214_v35, 1  ;;  %v286_v42 = vrot.slane %v1211_v34, 1  ;;  %v771_v43 = vpack.c.bf16 %v247_v37, %v245_v33  ;;  %v773_v44 = vpack.c.bf16 %v450_v39, %v448_v38  ;;  %v447_v45 = vld [vmem:[#allocation5 + $0x200] sm:$0xff]  ;;  %v449_v46 = vld [vmem:[#allocation5 + $0x210] sm:$0xff]  ;;  %v452_v48 = vld [vmem:[#allocation5 + $0x228] sm:$0xff] }
  0x6e   : > { %v454_v49 = vld [vmem:[#allocation5 + $0x238] sm:$0xff]  ;;  %v775_v51 = vpack.c.bf16 %v449_v46, %v447_v45  ;;  %vm700_vm2 = vmneg %vm208_vm0  ;;  %v451_v54 = vld [vmem:[#allocation5 + $0x220] sm:$0xff]  ;;  %v481_v31 = vrot.slane %v1211_v34, 2  ;;  %v480_v32 = vrot.slane %v1214_v35, 2  ;;  %v570_v35 = vlaneseq }
  0x6f   : > { %732 = vmatpush1.bf16.msra.mxu1 %v731_v12  ;;  %v287_v50 = vsel %vm284_vm1, %v285_v41, %v286_v42  ;;  %v777_v53 = vpack.c.bf16 %v454_v49, %v452_v48  ;;  %v453_v55 = vld [vmem:[#allocation5 + $0x230] sm:$0xff]  ;;  %v456_v56 = vld [vmem:[#allocation5 + $0x248] sm:$0xff]  ;;  %v458_v57 = vld [vmem:[#allocation5 + $0x258] sm:$0xff]  ;;  %v289_v59 = vsel %vm284_vm1, %v286_v42, %v288_v52 }
  0x70   : > { %764 = vmatpush1.bf16.msra.mxu0 %v763_v15  ;;  %734 = vmatprep.subr.bf16.mxu1 %v733_v16  ;;  %v779_v58 = vpack.c.bf16 %v453_v55, %v451_v54  ;;  %v781_v60 = vpack.c.bf16 %v458_v57, %v456_v56  ;;  %v455_v61 = vld [vmem:[#allocation5 + $0x240] sm:$0xff]  ;;  %v457_v62 = vld [vmem:[#allocation5 + $0x250] sm:$0xff]  ;;  %v460_v63 = vld [vmem:[#allocation5 + $0x268] sm:$0xff] }
  0x71   : > { %766 = vmatprep.subr.bf16.mxu0 %v765_v20  ;;  %v462_v1 = vld [vmem:[#allocation5 + $0x278] sm:$0xff]  ;;  %v783_v2 = vpack.c.bf16 %v457_v62, %v455_v61  ;;  %v459_v4 = vld [vmem:[#allocation5 + $0x260] sm:$0xff]  ;;  %v461_v5 = vld [vmem:[#allocation5 + $0x270] sm:$0xff] }
  0x72   : > { %v785_v3 = vpack.c.bf16 %v462_v1, %v460_v63  ;;  %v464_v6 = vld [vmem:[#allocation5 + $0x288] sm:$0xff]  ;;  %v466_v7 = vld [vmem:[#allocation5 + $0x298] sm:$0xff]  ;;  %v787_v8 = vpack.c.bf16 %v461_v5, %v459_v4  ;;  %v463_v10 = vld [vmem:[#allocation5 + $0x280] sm:$0xff] }
  0x73   : > { %736 = vmatpush1.bf16.msra.mxu1 %v735_v28  ;;  %v789_v9 = vpack.c.bf16 %v466_v7, %v464_v6  ;;  %v465_v11 = vld [vmem:[#allocation5 + $0x290] sm:$0xff]  ;;  %v468_v12 = vld [vmem:[#allocation5 + $0x2a8] sm:$0xff]  ;;  %v470_v13 = vld [vmem:[#allocation5 + $0x2b8] sm:$0xff] }
  0x74   : > { %768 = vmatpush1.bf16.msra.mxu0 %v767_v29  ;;  %738 = vmatprep.subr.bf16.mxu1 %v737_v30  ;;  %v791_v14 = vpack.c.bf16 %v465_v11, %v463_v10  ;;  %v793_v15 = vpack.c.bf16 %v470_v13, %v468_v12  ;;  %v467_v16 = vld [vmem:[#allocation5 + $0x2a0] sm:$0xff]  ;;  %v469_v17 = vld [vmem:[#allocation5 + $0x2b0] sm:$0xff]  ;;  %v472_v18 = vld [vmem:[#allocation5 + $0x2c8] sm:$0xff]  ;;  %v483_v29 = vrot.slane %v1219_v47, 2 }
  0x75   : > { %770 = vmatprep.subr.bf16.mxu0 %v769_v36  ;;  %v795_v19 = vpack.c.bf16 %v469_v17, %v467_v16  ;;  %v471_v21 = vld [vmem:[#allocation5 + $0x2c0] sm:$0xff]  ;;  %v473_v22 = vld [vmem:[#allocation5 + $0x2d0] sm:$0xff]  ;;  %v476_v23 = vld [vmem:[#allocation5 + $0x2e8] sm:$0xff]  ;;  %v482_v36 = vsel %vm479_vm3, %v480_v32, %v481_v31 }
  0x76   : > { %v799_v25 = vpack.c.bf16 %v473_v22, %v471_v21  ;;  %v475_v27 = vld [vmem:[#allocation5 + $0x2e0] sm:$0xff]  ;;  %v477_v28 = vld [vmem:[#allocation5 + $0x2f0] sm:$0xff]  ;;  %v484_v33 = vsel %vm479_vm3, %v481_v31, %v483_v29 }
  0x77   : > { %740 = vmatpush1.bf16.msra.mxu1 %v739_v40  ;;  %v803_v30 = vpack.c.bf16 %v477_v28, %v475_v27  ;;  %v568_v46 = vld [vmem:[%s1289_s2] sm:$0x3] }
  0x78   : > { %772 = vmatpush1.bf16.msra.mxu0 %v771_v43  ;;  %805 = vmatprep.subr.bf16.mxu1 %v773_v44 }
  0x79   : > { %774 = vmatprep.subr.bf16.mxu0 %v773_v44  ;;  %v571_v44 = vshrl.u32 %v570_v35, 7 }
  0x7a   : > { %357 = vmatmul.mubr.f32.vlgmr.msra.gmra.mrb[0].mxu1 %v287_v50 }
  0x7b   : > { %701 = vmatmul.mubr.msk.f32.vlgmr.msra.gmra.mrb[0].mxu0 %vm700_vm2, %v209_v24  ;;  %813 = vmatpush1.bf16.msra.mxu1 %v775_v51  ;;  %v478_v24 = vld [vmem:[#allocation5 + $0x2f8] sm:$0xff]  ;;  %v572_v45 = vsub.s32 0, %v571_v44  ;;  %v576_v47 = vsub.s32 1, %v571_v44 }
  0x7c   : > { %776 = vmatpush1.bf16.msra.mxu0 %v775_v51  ;;  %806 = vmatprep.subr.bf16.mxu1 %v777_v53  ;;  %v801_v26 = vpack.c.bf16 %v478_v24, %v476_v23 }
  0x7d   : > { %778 = vmatprep.subr.bf16.mxu0 %v777_v53  ;;  %362 = vmatprep.mubr.f32.mxu1 %v1029_v0  ;;  %v573_v48 = vrot.slane %v568_v46, %v572_v45  ;;  %v577_v50 = vrot.slane %v568_v46, %v576_v47 }
  0x7e   : > { %439 = vmatprep.mubr.f32.mxu0 %v1029_v0  ;;  %363 = vmatmul.mubr.f32.gmra.mrb[2].mxu1 %v289_v59 }
  0x7f   : > { %814 = vmatpush1.bf16.msra.mxu1 %v779_v58  ;;  %440 = vmatmul.mubr.f32.gmra.mrb[2].mxu0 %v1211_v34 }
  0x80   : > { %780 = vmatpush1.bf16.msra.mxu0 %v779_v58  ;;  %807 = vmatprep.subr.bf16.mxu1 %v781_v60 }
  0x81   : > { %782 = vmatprep.subr.bf16.mxu0 %v781_v60  ;;  %551 = vmatprep.mubr.f32.mxu0 %v1029_v0 }
  0x82   : > { %557 = vmatprep.mubr.f32.mxu1 %v1029_v0  ;;  %v474_v0 = vld [vmem:[#allocation5 + $0x2d8] sm:$0xff] }
  0x83   : > { %815 = vmatpush1.bf16.msra.mxu1 %v783_v2  ;;  %v797_v20 = vpack.c.bf16 %v474_v0, %v472_v18 }
  0x84   : > { %784 = vmatpush1.bf16.msra.mxu0 %v783_v2  ;;  %808 = vmatprep.subr.bf16.mxu1 %v785_v3 }
  0x85   : > { %786 = vmatprep.subr.bf16.mxu0 %v785_v3 }
  0x87   : > { %816 = vmatpush1.bf16.msra.mxu1 %v787_v8 }
  0x88   : > { %788 = vmatpush1.bf16.msra.mxu0 %v787_v8  ;;  %809 = vmatprep.subr.bf16.mxu1 %v789_v9 }
  0x89   : > { %790 = vmatprep.subr.bf16.mxu0 %v789_v9 }
  0x8b   : > { %817 = vmatpush1.bf16.msra.mxu1 %v791_v14 }
  0x8c   : > { %792 = vmatpush1.bf16.msra.mxu0 %v791_v14  ;;  %810 = vmatprep.subr.bf16.mxu1 %v793_v15 }
  0x8d   : > { %794 = vmatprep.subr.bf16.mxu0 %v793_v15 }
  0x8f   : > { %818 = vmatpush1.bf16.msra.mxu1 %v795_v19 }
  0x90   : > { %796 = vmatpush1.bf16.msra.mxu0 %v795_v19  ;;  %811 = vmatprep.subr.bf16.mxu1 %v797_v20 }
  0x91   : > { %798 = vmatprep.subr.bf16.mxu0 %v797_v20 }
  0x93   : > { %819 = vmatpush1.bf16.msra.mxu1 %v799_v25 }
  0x94   : > { %800 = vmatpush1.bf16.msra.mxu0 %v799_v25  ;;  %812 = vmatprep.subr.bf16.mxu1 %v801_v26 }
  0x95   : > { %802 = vmatprep.subr.bf16.mxu0 %v801_v26 }
  0x97   : > { %820 = vmatpush1.bf16.msra.mxu1 %v803_v30 }
  0x98   : > { %804 = vmatpush1.bf16.msra.mxu0 %v803_v30 }
  0x9a   : > { %558 = vmatmul.mubr.f32.vlgmr.msra.gmra.mrb[4].mxu1 %v484_v33 }
  0x9b   : > { %552 = vmatmul.mubr.f32.vlgmr.msra.gmra.mrb[0].mxu0 %v482_v36 }
 0x14d   : > { %v358_v37 = vpop.f32.mrb[0].mxu1 }
 0x14e   : > { %v360_v38 = vpop.f32.mrb[1].mxu1 }
 0x151   : > { %v364_v39 = vpop.f32.mrb[2].mxu1 }
 0x152   : > { %v441_v40 = vpop.f32.mrb[2].mxu0  ;;  %v366_v41 = vpop.f32.mrb[3].mxu1 }
 0x153   : > { %v442_v42 = vadd.f32 %v441_v40, %v364_v39  ;;  %v443_v34 = vpop.f32.mrb[3].mxu0 }
 0x154   : > { %v444_v43 = vadd.f32 %v443_v34, %v366_v41 }
 0x16d   : > { %v559_v49 = vpop.f32.mrb[4].mxu1 }
 0x16e   : > { %v553_v51 = vpop.f32.mrb[0].mxu0  ;;  %v566_v52 = vadd.f32 %v559_v49, %v442_v42  ;;  %v561_v53 = vpop.f32.mrb[5].mxu1 }
 0x16f   : > { %v821_v54 = vadd.f32 %v553_v51, %v358_v37  ;;  %v555_v55 = vpop.f32.mrb[1].mxu0  ;;  %v567_v56 = vadd.f32 %v561_v53, %v444_v43 }
 0x170   : > { %v582_v57 = vadd.f32 %v573_v48, %v566_v52  ;;  %v822_v58 = vadd.f32 %v555_v55, %v360_v38 }
 0x171   : > { %v580_v59 = vadd.f32 %v821_v54, %v573_v48  ;;  %v583_v60 = vadd.f32 %v577_v50, %v567_v56 }
 0x172   : > { %v586_v61 = vmax.f32 %v582_v57, 0.0  ;;  %v581_v62 = vadd.f32 %v822_v58, %v577_v50 }
 0x173   : > { %v584_v63 = vmax.f32 %v580_v59, 0.0  ;;  %v587_v1 = vmax.f32 %v583_v60, 0.0 }
 0x174   : > { %590 = vst [vmem:[%s203_s25 + $0x10] sm:$0xff] %v586_v61  ;;  %v585_v2 = vmax.f32 %v581_v62, 0.0 }
 0x175   : > { %588 = vst [vmem:[%s203_s25] sm:$0xff] %v584_v63  ;;  %591 = vst [vmem:[%s203_s25 + $0x18] sm:$0xff] %v587_v1 }
 0x176   : > { %589 = vst [vmem:[%s203_s25 + $0x8] sm:$0xff] %v585_v2 }
 0x177   : > { %964 = shalt.err (!%p961_p7)
}
 0x178   : > { %s965_s22 = scalar_lea.hbm %s1243_s27, 512  ;;  %s969_s9 = scalar_lea.hbm %s1290_s3, 1024 }
 0x179   : > { %p966_p9 = scmp.ne.s32.totalorder %s1243_s27, %s965_s22  ;;  %p970_p5 = scmp.lt.u32.totalorder %s1243_s27, %s1290_s3 }
 0x17a   : > { %p971_p11 = scmp.lt.u32.totalorder %s969_s9, %s965_s22  ;;  %p973_p4 = scmp.lt.u32.totalorder %s965_s22, %s1243_s27 }
 0x17b   : > { %p967_p2 = pnand %p966_p9, %p1144_p12 }
 0x17c   : > { %p972_p1 = por %p971_p11, %p970_p5 }
 0x17d   : > { %p968_p0 = pneg %p967_p2 }
 0x17e   : > { %p974_p6 = por %p973_p4, %p972_p1 }
 0x180   : > { %p975_p8 = pnand %p974_p6, %p968_p0 }
 0x182   : > { %978 = shalt.err (!%p975_p8)
}
 0x183   : > { %s1031_s4 = smov 256   ;;  %s1032_s25 = smov 16  }
 0x184   : > { %835 = dma.vmem_to_hbm [thread:$0]  (%p1144_p12), %s1238_s26, 512, %s1243_s27, %s593_s16, %s1031_s4, %s1031_s4, %s1032_s25  }
 0x185 PF: > { %s621_s5 = sand.u32 1, %s1009_s12   ;;  %p1305_p10 = scmp.ne.s32.totalorder %s1295_s19, 0 }
 0x186   : > { %p1306_p13 = scmp.ge.s32.totalorder %s1021_s15, 2  ;;  %s622_s10 = scalar_lea.sflag [#allocation4], %s621_s5 }
 0x188   : > { %p846_p3 = pnand %p1306_p13, %p1305_p10 }
 0x18a   : > { %1004 = dma.done.wait (!%p846_p3), %s622_s10, 512  }
 0x18b   : > { %1006 = vsyncadd (!%p846_p3), %s622_s10, 4294966784  ;;  %p17_p7 = scmp.ge.s32.totalorder %s1109_s24, 4   ;;  %s1307_s12 = smov %s1013_s13 }
 0x18c   : > { %s1308_s13 = smov %s1017_s14  ;;  %s1309_s14 = smov %s1140_s17 }
 0x18d   : > { %s1310_s15 = smov %s1109_s24  ;;  %19 = sbr.rel (!%p17_p7) target bundleno = 6 (0x6), region = 83 }
 0x194   :  { %627 = vsyncpa [#allocation3], 1 }
 0x195   :  { %629 = vsyncpa [#allocation3 + $0x1], 1 }
 0x196   :  { %630 = vsyncpa [#allocation6], 1 }
 0x197   :  { %631 = vsyncpa [#allocation4], 1 }
 0x198   :  { %633 = vsyncpa [#allocation4 + $0x1], 1 }

</bundles_post_ra>
